<compile_context>
chip_gen: v6e
topology: v6e:2x2x1
jax: 0.10.0
libtpu: 0.0.40
codegen_flags: <defaults>
</compile_context>

<pallas_src>
import functools

import jax
import jax.numpy as jnp
from jax.experimental import pallas as pl
from jax.experimental.pallas import tpu as pltpu


_MAX_TILE = 256  # (tn, tm) f32 distance tile = 256 KiB; safe on v5e/v6e/v7x.


def _pick_tile(n, max_tile=_MAX_TILE):
    """Largest tile <= max_tile dividing n, preferring lane/sublane-friendly sizes."""
    if n <= max_tile:
        return n
    for align in (128, 8):
        t = (max_tile // align) * align
        while t >= align:
            if n % t == 0:
                return t
            t -= align
    return n  # no friendly divisor -> single full-size tile


def _chamfer_kernel(x_ref, y_ref, o_ref, x2_c, y2_c, row_acc, col_acc, acc):
    # x_ref: (1, tn, D)   y_ref: (1, tm, D)    o_ref: (1, 1, 128)
    # x2_c: (tn, 1)       y2_c: (nj, 1, tm)    row_acc: (tn, 1)
    # col_acc: (nj, 1, tm)                     acc: (1, 1)
    i = pl.program_id(1)          # N-tile index
    j = pl.program_id(2)          # M-tile index (innermost)
    ni = pl.num_programs(1)
    nj = pl.num_programs(2)

    @pl.when((i == 0) & (j == 0))
    def _init_batch():
        acc[...] = jnp.zeros_like(acc)

    # TODO(synk): if inputs are bf16, feed the MXU in bf16 (keep f32 accum)
    # to halve HBM traffic; kept f32 since the reference module is f32.
    x = x_ref[0]                                              # (tn, D)
    y = y_ref[0]                                              # (tm, D)

    # |x|^2 per row: recomputed only when the N tile changes (j == 0).
    @pl.when(j == 0)
    def _cache_x2():
        x2_c[...] = jnp.sum(x * x, axis=-1, keepdims=True)    # (tn, 1)

    # |y|^2 per row, stored pre-transposed to lane layout, once per M tile.
    @pl.when(i == 0)
    def _cache_y2():
        y2 = jnp.sum(y * y, axis=-1, keepdims=True)           # (tm, 1)
        y2_c[j] = y2.T                                        # (1, tm)

    x2 = x2_c[...]                                            # (tn, 1)
    y2 = y2_c[j]                                              # (1, tm)

    # -2 * x @ y^T on the MXU; contracting dim 1 of both operands avoids an
    # explicit transpose of the y tile before the matmul.
    g = jax.lax.dot_general(
        x * -2.0, y, (((1,), (1,)), ((), ())),
        preferred_element_type=jnp.float32)                   # (tn, tm)
    d2 = (g + y2) + x2   # squared distances (unclamped; clamp deferred to sqrt)

    row_min = jnp.min(d2, axis=1, keepdims=True)              # (tn, 1)
    col_min = jnp.min(d2, axis=0, keepdims=True)              # (1, tm)

    # Running minima; stale scratch reads at j==0 / i==0 are discarded by the
    # select, so no separate init branch is needed.
    rmin = jnp.where(j == 0, row_min, jnp.minimum(row_acc[...], row_min))
    row_acc[...] = rmin
    cmin = jnp.where(i == 0, col_min, jnp.minimum(col_acc[j], col_min))
    col_acc[j] = cmin

    # Rows of this N tile have now seen every M tile: sqrt only tn values (EUP).
    @pl.when(j == nj - 1)
    def _row_finalize():
        acc[...] += jnp.sum(jnp.sqrt(jnp.maximum(rmin, 0.0)), keepdims=True)

    # Columns of this M tile have now seen every N tile: sqrt only tm values.
    @pl.when(i == ni - 1)
    def _col_finalize():
        acc[...] += jnp.sum(jnp.sqrt(jnp.maximum(cmin, 0.0)), keepdims=True)

    # Very last tile of this batch: write the lane-dense per-batch output once.
    @pl.when((i == ni - 1) & (j == nj - 1))
    def _write_out():
        o_ref[...] = jnp.broadcast_to(acc[...].reshape(1, 1, 1), o_ref.shape)


@functools.partial(jax.jit, static_argnames=("reduction", "p"))
def chamfers_loss(x, y, reduction="mean", p=2):
    """Pallas equivalent of ChamfersLoss(reduction, p).forward(x, y)."""
    # TODO(synk): only p=2 (Euclidean) is implemented; a general p-norm cdist
    # would need the (tn, tm, D) difference tensor instead of the MXU path.
    assert p == 2, "only p=2 supported"
    assert reduction in ("mean", "sum"), "only 'mean'/'sum' supported"
    B, N, D = x.shape
    By, M, Dy = y.shape
    assert By == B and Dy == D

    x = x.astype(jnp.float32)
    y = y.astype(jnp.float32)

    tn = _pick_tile(N)
    tm = _pick_tile(M)
    ni = N // tn
    nj = M // tm
    grid = (B, ni, nj)

    # TODO(synk): for tiny N/M with large B, pack several batch elements per
    # grid step to amortize the ~0.35 us per-step overhead.
    out = pl.pallas_call(
        _chamfer_kernel,
        out_shape=jax.ShapeDtypeStruct((B, 1, 128), jnp.float32),
        grid_spec=pltpu.PrefetchScalarGridSpec(
            num_scalar_prefetch=0,
            grid=grid,
            in_specs=[
                pl.BlockSpec((1, tn, D), lambda b, i, j: (b, i, 0)),
                pl.BlockSpec((1, tm, D), lambda b, i, j: (b, j, 0)),
            ],
            out_specs=pl.BlockSpec((1, 1, 128), lambda b, i, j: (b, 0, 0)),
            scratch_shapes=[
                pltpu.VMEM((tn, 1), jnp.float32),      # |x|^2 cache (this N tile)
                pltpu.VMEM((nj, 1, tm), jnp.float32),  # |y|^2 cache, lane layout
                pltpu.VMEM((tn, 1), jnp.float32),      # running row-min (this N tile)
                pltpu.VMEM((nj, 1, tm), jnp.float32),  # running col-min (all M tiles)
                pltpu.VMEM((1, 1), jnp.float32),       # per-batch scalar accumulator
            ],
        ),
        compiler_params=pltpu.CompilerParams(
            dimension_semantics=("parallel", "arbitrary", "arbitrary"),
            vmem_limit_bytes=32 * 1024 * 1024,
        ),
    )(x, y)

    per_batch = out[:, 0, 0]                                    # (B,)
    reduced = jnp.mean(per_batch) if reduction == "mean" else jnp.sum(per_batch)
    # forward(): chamfers_distance(...) / relative_distances.shape[-1]  (== M)
    return reduced / M


def _reference(x, y, reduction="mean"):
    # Pure-JAX reference mirroring the torch module, for correctness checking.
    d = jnp.sqrt(
        jnp.maximum(
            jnp.sum((x[:, :, None, :] - y[:, None, :, :]) ** 2, axis=-1), 0.0
        )
    )
    a = jnp.min(d, axis=-1)
    b = jnp.min(d, axis=-2)
    loss_per_batch = jnp.sum(a, axis=-1) + jnp.sum(b, axis=-1)
    red = jnp.mean(loss_per_batch) if reduction == "mean" else jnp.sum(loss_per_batch)
    return red / d.shape[-1]


if __name__ == "__main__":
    key = jax.random.PRNGKey(0)
    kx, ky, kx2, ky2 = jax.random.split(key, 4)

    # Small case (single tile per batch).
    B, N, M, D = 2, 16, 24, 8
    x = jax.random.normal(kx, (B, N, D), dtype=jnp.float32)
    y = jax.random.normal(ky, (B, M, D), dtype=jnp.float32)
    loss = jax.block_until_ready(chamfers_loss(x, y, reduction="mean", p=2))
    ref = _reference(x, y, reduction="mean")
    assert jnp.allclose(loss, ref, rtol=1e-3, atol=1e-3), (loss, ref)

    # Moderate case that exercises the multi-tile accumulator path
    # (N/tn = 2 with tn=256, M/tm = 3 with tm=128).
    B2, N2, M2 = 2, 512, 384
    x2 = jax.random.normal(kx2, (B2, N2, D), dtype=jnp.float32)
    y2 = jax.random.normal(ky2, (B2, M2, D), dtype=jnp.float32)
    loss2 = jax.block_until_ready(chamfers_loss(x2, y2, reduction="sum", p=2))
    ref2 = _reference(x2, y2, reduction="sum")
    assert jnp.allclose(loss2, ref2, rtol=2e-3, atol=2e-3), (loss2, ref2)

    print("KERNEL_OK")
</pallas_src>

<mosaic_0001>
module attributes {stable_mosaic.version = 11 : i64} {
  func.func @_chamfer_kernel(%arg0: i32, %arg1: i32, %arg2: i32, %arg3: memref<1x16x8xf32, #tpu.memory_space<vmem>>, %arg4: memref<1x24x8xf32, #tpu.memory_space<vmem>>, %arg5: memref<1x1x128xf32, #tpu.memory_space<vmem>>, %arg6: memref<16x1xf32, #tpu.memory_space<vmem>>, %arg7: memref<1x1x24xf32, #tpu.memory_space<vmem>>, %arg8: memref<16x1xf32, #tpu.memory_space<vmem>>, %arg9: memref<1x1x24xf32, #tpu.memory_space<vmem>>, %arg10: memref<1x1xf32, #tpu.memory_space<vmem>>) attributes {dimension_semantics = [#tpu.dimension_semantics<parallel>, #tpu.dimension_semantics<arbitrary>, #tpu.dimension_semantics<arbitrary>], iteration_bounds = array<i64: 2, 1, 1>, scalar_prefetch = 0 : i64, scratch_operands = 5 : i64, tpu.core_type = #tpu.core_type<tc>, window_params = [{transform_indices = @transform_0, window_bounds = array<i64: 1, 16, 8>}, {transform_indices = @transform_1, window_bounds = array<i64: 1, 24, 8>}, {transform_indices = @transform_2, window_bounds = array<i64: 1, 1, 128>}]} {
    %c0_i32 = arith.constant 0 : i32
    %0 = arith.cmpi eq, %arg1, %c0_i32 : i32
    %c0_i32_0 = arith.constant 0 : i32
    %1 = arith.cmpi eq, %arg2, %c0_i32_0 : i32
    %2 = arith.andi %0, %1 : i1
    %3 = arith.extui %2 : i1 to i32
    %c0_i32_1 = arith.constant 0 : i32
    %4 = arith.cmpi ne, %3, %c0_i32_1 : i32
    scf.if %4 {
      %cst_35 = arith.constant 0.000000e+00 : f32
      %56 = vector.broadcast %cst_35 : f32 to vector<1x1xf32>
      %c0_36 = arith.constant 0 : index
      %c0_37 = arith.constant 0 : index
      %57 = vector.load %arg10[%c0_36, %c0_37] : memref<1x1xf32, #tpu.memory_space<vmem>>, vector<1x1xf32>
      tpu.vector_store %arg10[%c0_36, %c0_37], %56 {strides = array<i32>} : memref<1x1xf32, #tpu.memory_space<vmem>>, vector<1x1xf32>,
    } else {
    }
    %c0 = arith.constant 0 : index
    %c0_2 = arith.constant 0 : index
    %c0_3 = arith.constant 0 : index
    %5 = vector.load %arg3[%c0, %c0_2, %c0_3] : memref<1x16x8xf32, #tpu.memory_space<vmem>>, vector<1x16x8xf32>
    %6 = vector.shape_cast %5 : vector<1x16x8xf32> to vector<16x8xf32>
    %c0_4 = arith.constant 0 : index
    %c0_5 = arith.constant 0 : index
    %c0_6 = arith.constant 0 : index
    %7 = vector.load %arg4[%c0_4, %c0_5, %c0_6] : memref<1x24x8xf32, #tpu.memory_space<vmem>>, vector<1x24x8xf32>
    %8 = vector.shape_cast %7 : vector<1x24x8xf32> to vector<24x8xf32>
    %c0_i32_7 = arith.constant 0 : i32
    %9 = arith.cmpi eq, %arg2, %c0_i32_7 : i32
    %10 = arith.extui %9 : i1 to i32
    %c0_i32_8 = arith.constant 0 : i32
    %11 = arith.cmpi ne, %10, %c0_i32_8 : i32
    scf.if %11 {
      %56 = arith.mulf %6, %6 : vector<16x8xf32>
      %cst_35 = arith.constant dense<0.000000e+00> : vector<16xf32>
      %57 = vector.multi_reduction <add>, %56, %cst_35 [1] : vector<16x8xf32> to vector<16xf32>
      %58 = vector.shape_cast %57 : vector<16xf32> to vector<16x1xf32>
      %c0_36 = arith.constant 0 : index
      %c0_37 = arith.constant 0 : index
      %59 = vector.load %arg6[%c0_36, %c0_37] : memref<16x1xf32, #tpu.memory_space<vmem>>, vector<16x1xf32>
      tpu.vector_store %arg6[%c0_36, %c0_37], %58 {strides = array<i32>} : memref<16x1xf32, #tpu.memory_space<vmem>>, vector<16x1xf32>,
    } else {
    }
    %c0_i32_9 = arith.constant 0 : i32
    %12 = arith.cmpi eq, %arg1, %c0_i32_9 : i32
    %13 = arith.extui %12 : i1 to i32
    %c0_i32_10 = arith.constant 0 : i32
    %14 = arith.cmpi ne, %13, %c0_i32_10 : i32
    scf.if %14 {
      %56 = arith.mulf %8, %8 : vector<24x8xf32>
      %cst_35 = arith.constant dense<0.000000e+00> : vector<24xf32>
      %57 = vector.multi_reduction <add>, %56, %cst_35 [1] : vector<24x8xf32> to vector<24xf32>
      %58 = vector.shape_cast %57 : vector<24xf32> to vector<24x1xf32>
      %59 = tpu.transpose %58, [1, 0] : vector<24x1xf32> -> vector<1x24xf32>
      %60 = arith.index_cast %arg2 : i32 to index
      %c0_36 = arith.constant 0 : index
      %c0_37 = arith.constant 0 : index
      %61 = vector.load %arg7[%60, %c0_36, %c0_37] : memref<1x1x24xf32, #tpu.memory_space<vmem>>, vector<1x1x24xf32>
      %62 = vector.shape_cast %61 : vector<1x1x24xf32> to vector<1x24xf32>
      %63 = vector.shape_cast %59 : vector<1x24xf32> to vector<1x1x24xf32>
      tpu.vector_store %arg7[%60, %c0_36, %c0_37], %63 {strides = array<i32>} : memref<1x1x24xf32, #tpu.memory_space<vmem>>, vector<1x1x24xf32>,
    } else {
    }
    %c0_11 = arith.constant 0 : index
    %c0_12 = arith.constant 0 : index
    %15 = vector.load %arg6[%c0_11, %c0_12] : memref<16x1xf32, #tpu.memory_space<vmem>>, vector<16x1xf32>
    %16 = arith.index_cast %arg2 : i32 to index
    %c0_13 = arith.constant 0 : index
    %c0_14 = arith.constant 0 : index
    %17 = vector.load %arg7[%16, %c0_13, %c0_14] : memref<1x1x24xf32, #tpu.memory_space<vmem>>, vector<1x1x24xf32>
    %18 = vector.shape_cast %17 : vector<1x1x24xf32> to vector<1x24xf32>
    %cst = arith.constant -2.000000e+00 : f32
    %19 = vector.broadcast %cst : f32 to vector<16x8xf32>
    %20 = arith.mulf %6, %19 : vector<16x8xf32>
    %cst_15 = arith.constant dense<0.000000e+00> : vector<16x24xf32>
    %21 = tpu.matmul %20, %8, %cst_15 {dimension_numbers = #tpu.dot_dimension_numbers<[1], [1], [0], [0], [0, 0, 1, 0], [], []>} : vector<16x8xf32>, vector<24x8xf32>, vector<16x24xf32> -> vector<16x24xf32>
    %22 = vector.broadcast %18 : vector<1x24xf32> to vector<16x24xf32>
    %23 = arith.addf %21, %22 : vector<16x24xf32>
    %24 = vector.broadcast %15 : vector<16x1xf32> to vector<16x24xf32>
    %25 = arith.addf %23, %24 : vector<16x24xf32>
    %cst_16 = arith.constant dense<0x7F800000> : vector<16xf32>
    %26 = vector.multi_reduction <minimumf>, %25, %cst_16 [1] : vector<16x24xf32> to vector<16xf32>
    %27 = vector.shape_cast %26 : vector<16xf32> to vector<16x1xf32>
    %cst_17 = arith.constant dense<0x7F800000> : vector<24xf32>
    %28 = vector.multi_reduction <minimumf>, %25, %cst_17 [0] : vector<16x24xf32> to vector<24xf32>
    %29 = vector.shape_cast %28 : vector<24xf32> to vector<1x24xf32>
    %c0_i32_18 = arith.constant 0 : i32
    %30 = arith.cmpi eq, %arg2, %c0_i32_18 : i32
    %c0_19 = arith.constant 0 : index
    %c0_20 = arith.constant 0 : index
    %31 = vector.load %arg8[%c0_19, %c0_20] : memref<16x1xf32, #tpu.memory_space<vmem>>, vector<16x1xf32>
    %32 = arith.minimumf %31, %27 : vector<16x1xf32>
    %33 = arith.select %30, %27, %32 : vector<16x1xf32>
    %c0_21 = arith.constant 0 : index
    %c0_22 = arith.constant 0 : index
    %34 = vector.load %arg8[%c0_21, %c0_22] : memref<16x1xf32, #tpu.memory_space<vmem>>, vector<16x1xf32>
    tpu.vector_store %arg8[%c0_21, %c0_22], %33 {strides = array<i32>} : memref<16x1xf32, #tpu.memory_space<vmem>>, vector<16x1xf32>,
    %c0_i32_23 = arith.constant 0 : i32
    %35 = arith.cmpi eq, %arg1, %c0_i32_23 : i32
    %36 = arith.index_cast %arg2 : i32 to index
    %c0_24 = arith.constant 0 : index
    %c0_25 = arith.constant 0 : index
    %37 = vector.load %arg9[%36, %c0_24, %c0_25] : memref<1x1x24xf32, #tpu.memory_space<vmem>>, vector<1x1x24xf32>
    %38 = vector.shape_cast %37 : vector<1x1x24xf32> to vector<1x24xf32>
    %39 = arith.minimumf %38, %29 : vector<1x24xf32>
    %40 = arith.select %35, %29, %39 : vector<1x24xf32>
    %41 = arith.index_cast %arg2 : i32 to index
    %c0_26 = arith.constant 0 : index
    %c0_27 = arith.constant 0 : index
    %42 = vector.load %arg9[%41, %c0_26, %c0_27] : memref<1x1x24xf32, #tpu.memory_space<vmem>>, vector<1x1x24xf32>
    %43 = vector.shape_cast %42 : vector<1x1x24xf32> to vector<1x24xf32>
    %44 = vector.shape_cast %40 : vector<1x24xf32> to vector<1x1x24xf32>
    tpu.vector_store %arg9[%41, %c0_26, %c0_27], %44 {strides = array<i32>} : memref<1x1x24xf32, #tpu.memory_space<vmem>>, vector<1x1x24xf32>,
    %c0_i32_28 = arith.constant 0 : i32
    %45 = arith.cmpi eq, %arg2, %c0_i32_28 : i32
    %46 = arith.extui %45 : i1 to i32
    %c0_i32_29 = arith.constant 0 : i32
    %47 = arith.cmpi ne, %46, %c0_i32_29 : i32
    scf.if %47 {
      %c0_35 = arith.constant 0 : index
      %c0_36 = arith.constant 0 : index
      %56 = vector.load %arg10[%c0_35, %c0_36] : memref<1x1xf32, #tpu.memory_space<vmem>>, vector<1x1xf32>
      %cst_37 = arith.constant 0.000000e+00 : f32
      %57 = vector.broadcast %cst_37 : f32 to vector<16x1xf32>
      %58 = arith.maximumf %33, %57 : vector<16x1xf32>
      %59 = math.sqrt %58 : vector<16x1xf32>
      %60 = vector.shape_cast %59 : vector<16x1xf32> to vector<1x16x1xf32>
      %cst_38 = arith.constant dense<0.000000e+00> : vector<1xf32>
      %61 = vector.multi_reduction <add>, %60, %cst_38 [1, 2] : vector<1x16x1xf32> to vector<1xf32>
      %62 = vector.shape_cast %61 : vector<1xf32> to vector<1x1x1xf32>
      %63 = vector.extract %62[0, 0, 0] : f32 from vector<1x1x1xf32>
      %64 = vector.broadcast %63 : f32 to vector<1x1xf32>
      %65 = arith.addf %56, %64 : vector<1x1xf32>
      %c0_39 = arith.constant 0 : index
      %c0_40 = arith.constant 0 : index
      %66 = vector.load %arg10[%c0_39, %c0_40] : memref<1x1xf32, #tpu.memory_space<vmem>>, vector<1x1xf32>
      tpu.vector_store %arg10[%c0_39, %c0_40], %65 {strides = array<i32>} : memref<1x1xf32, #tpu.memory_space<vmem>>, vector<1x1xf32>,
    } else {
    }
    %c0_i32_30 = arith.constant 0 : i32
    %48 = arith.cmpi eq, %arg1, %c0_i32_30 : i32
    %49 = arith.extui %48 : i1 to i32
    %c0_i32_31 = arith.constant 0 : i32
    %50 = arith.cmpi ne, %49, %c0_i32_31 : i32
    scf.if %50 {
      %c0_35 = arith.constant 0 : index
      %c0_36 = arith.constant 0 : index
      %56 = vector.load %arg10[%c0_35, %c0_36] : memref<1x1xf32, #tpu.memory_space<vmem>>, vector<1x1xf32>
      %cst_37 = arith.constant 0.000000e+00 : f32
      %57 = vector.broadcast %cst_37 : f32 to vector<1x24xf32>
      %58 = arith.maximumf %40, %57 : vector<1x24xf32>
      %59 = math.sqrt %58 : vector<1x24xf32>
      %60 = vector.shape_cast %59 : vector<1x24xf32> to vector<1x1x24xf32>
      %cst_38 = arith.constant dense<0.000000e+00> : vector<1xf32>
      %61 = vector.multi_reduction <add>, %60, %cst_38 [1, 2] : vector<1x1x24xf32> to vector<1xf32>
      %62 = vector.shape_cast %61 : vector<1xf32> to vector<1x1x1xf32>
      %63 = vector.extract %62[0, 0, 0] : f32 from vector<1x1x1xf32>
      %64 = vector.broadcast %63 : f32 to vector<1x1xf32>
      %65 = arith.addf %56, %64 : vector<1x1xf32>
      %c0_39 = arith.constant 0 : index
      %c0_40 = arith.constant 0 : index
      %66 = vector.load %arg10[%c0_39, %c0_40] : memref<1x1xf32, #tpu.memory_space<vmem>>, vector<1x1xf32>
      tpu.vector_store %arg10[%c0_39, %c0_40], %65 {strides = array<i32>} : memref<1x1xf32, #tpu.memory_space<vmem>>, vector<1x1xf32>,
    } else {
    }
    %c0_i32_32 = arith.constant 0 : i32
    %51 = arith.cmpi eq, %arg1, %c0_i32_32 : i32
    %c0_i32_33 = arith.constant 0 : i32
    %52 = arith.cmpi eq, %arg2, %c0_i32_33 : i32
    %53 = arith.andi %51, %52 : i1
    %54 = arith.extui %53 : i1 to i32
    %c0_i32_34 = arith.constant 0 : i32
    %55 = arith.cmpi ne, %54, %c0_i32_34 : i32
    scf.if %55 {
      %c0_35 = arith.constant 0 : index
      %c0_36 = arith.constant 0 : index
      %56 = vector.load %arg10[%c0_35, %c0_36] : memref<1x1xf32, #tpu.memory_space<vmem>>, vector<1x1xf32>
      %57 = vector.shape_cast %56 : vector<1x1xf32> to vector<1x1x1xf32>
      %58 = vector.shape_cast %57 : vector<1x1x1xf32> to vector<1x1x1xf32>
      %59 = vector.broadcast %58 : vector<1x1x1xf32> to vector<1x1x128xf32>
      %c0_37 = arith.constant 0 : index
      %c0_38 = arith.constant 0 : index
      %c0_39 = arith.constant 0 : index
      %60 = vector.load %arg5[%c0_37, %c0_38, %c0_39] : memref<1x1x128xf32, #tpu.memory_space<vmem>>, vector<1x1x128xf32>
      tpu.vector_store %arg5[%c0_37, %c0_38, %c0_39], %59 {strides = array<i32>} : memref<1x1x128xf32, #tpu.memory_space<vmem>>, vector<1x1x128xf32>,
    } else {
    }
    return
  }
  func.func @transform_0(%arg0: i32, %arg1: i32, %arg2: i32) -> (i32, i32, i32) {
    %c0_i32 = arith.constant 0 : i32
    %c0_i32_0 = arith.constant 0 : i32
    return %arg0, %arg1, %c0_i32 : i32, i32, i32
  }
  func.func @transform_1(%arg0: i32, %arg1: i32, %arg2: i32) -> (i32, i32, i32) {
    %c0_i32 = arith.constant 0 : i32
    %c0_i32_0 = arith.constant 0 : i32
    return %arg0, %arg2, %c0_i32 : i32, i32, i32
  }
  func.func @transform_2(%arg0: i32, %arg1: i32, %arg2: i32) -> (i32, i32, i32) {
    %c0_i32 = arith.constant 0 : i32
    %c0_i32_0 = arith.constant 0 : i32
    %c0_i32_1 = arith.constant 0 : i32
    return %arg0, %c0_i32, %c0_i32_0 : i32, i32, i32
  }
}

</mosaic_0001>

<bundles_post_ra>
// kernel: chamfers_loss.1
= control target key start
LH: loop header
LB: loop body
LE: loop exit
PB: predicated region body
PF: predicated region fallthrough
CT: control target
= control target key end

     0   :  { %s711_s9 = smov 0   ;;  %s713_s10 = smov 0   ;;  %s774_s0 = inlined_call_operand.vmem [shape: f32[2,16,8], index: 0, kind: input, shape index: {}]   ;;  %s775_s1 = inlined_call_operand.vmem [shape: f32[2,24,8], index: 1, kind: input, shape index: {}]   ;;  %s776_s2 = inlined_call_operand.vmem [shape: f32[2,1,128], index: 2, kind: output, shape index: {}]  }
   0x1   :  { %s715_s11 = smov 0  }
   0x2 LB: > { %s31_s12 = sadd.s32 1, %s688_s10  ;;  %p604_p0 = scmp.ge.s32.totalorder %s692_s11, 1  ;;  %s692_s11 = sphi %s715_s11, %s12_s11   ;;  %s688_s10 = sphi %s713_s10, %s778_s10   ;;  %s684_s9 = sphi %s711_s9, %s777_s9  }
   0x3   : > { %p33_p1 = scmp.ge.s32.totalorder %s31_s12, 2  ;;  %p155_p2 = scmp.lt.s32.totalorder %s692_s11, 3 }
   0x5   : > { %s780_s12 = smov (%p33_p1, %s31_s12), 0  ;;  %p156_p3 = pnand %p604_p0, %p155_p2 }
   0x6   : > { %p189_p4 = scmp.lt.s32.totalorder (!%p156_p3), %s684_s9, 1 }
   0x7   : > { %159 = sbr.rel (%p156_p3) target bundleno = 854 (0x356), region = 28 }
   0xc   : > { %s782_s9 = smov (!%p189_p4, %s684_s9), 1  ;;  %vm229_vm0 = vcmask 64512   ;;  %v694_v17 = vmov 0   ;;  %vm236_vm1 = vcmask 7168   ;;  %vm288_vm2 = vcmask 188416  }
   0xd   : > { %s616_s13 = sshll.u32 %s782_s9, 4  ;;  %s631_s14 = smul.u32 24, %s782_s9  ;;  %662 = vset.pattern.permute.xlu1 %v694_v17  ;;  %663 = vset.pattern.permute.xlu0 %v694_v17  ;;  %vm405_vm3 = vcmask 195584   ;;  %vm217_vm10 = vcmask 0  }
   0xe   : > { %s196_s17 = scalar_lea.vmem %s774_s0, %s616_s13  ;;  %s210_s25 = scalar_lea.vmem %s776_s2, %s782_s9 }
   0xf   : > { %v219_v0 = vld [vmem:[%s196_s17] sm:$0xff]  ;;  %s206_s20 = scalar_lea.vmem %s775_s1, %s631_s14  ;;  %v220_v1 = vld [vmem:[%s196_s17 + $0x8] sm:$0xff] }
  0x10   : > { %v227_v2 = vmul.f32 %v219_v0, %v219_v0  ;;  %v221_v3 = vld [vmem:[%s206_s20] sm:$0xff]  ;;  %v228_v4 = vmul.f32 %v220_v1, %v220_v1  ;;  %v222_v5 = vld [vmem:[%s206_s20 + $0x8] sm:$0xff]  ;;  %v223_v6 = vld [vmem:[%s206_s20 + $0x10] sm:$0xff]  ;;  %v294_v7 = vmul.f32 -2.0, %v219_v0  ;;  %v295_v16 = vmul.f32 -2.0, %v220_v1 }
  0x11   : > { %v242_v8 = vmul.f32 %v221_v3, %v221_v3  ;;  %v243_v9 = vmul.f32 %v222_v5, %v222_v5  ;;  %622 = vmatprep.subr.msk.mxu0 %vm229_vm0, %v223_v6  ;;  %v244_v13 = vmul.f32 %v223_v6, %v223_v6 }
  0x12   : > { %v230_v10 = vsel %vm229_vm0, %v227_v2, 0.0  ;;  %623 = vmatpush3.xpose.msk.msra.mxu0 %vm229_vm0, %v223_v6  ;;  %628 = vmatprep.mubr.msk.f32.mxu0 %vm229_vm0, %v294_v7  ;;  %v233_v12 = vsel %vm229_vm0, %v228_v4, 0.0  ;;  %v695_v4 = vmov 0.0  }
  0x13   : > { %231 = vadd.xlane.f32.xlu0 %v230_v10  ;;  %v246_v11 = vsel %vm229_vm0, %v242_v8, 0.0  ;;  %624 = vmatprep.subr.msk.mxu0 %vm229_vm0, %v222_v5  ;;  %v249_v14 = vsel %vm229_vm0, %v243_v9, 0.0  ;;  %v252_v15 = vsel %vm229_vm0, %v244_v13, 0.0  ;;  %218 = vst.msk [vmem:[#allocation6] sm:$0x1] %vm217_vm10, %v695_v4 }
  0x14   : > { %247 = vadd.xlane.f32.xlu1 %v246_v11 }
  0x16   : > { %625 = vmatpush3.xpose.msk.msra.mxu0 %vm229_vm0, %v222_v5 }
  0x17   : > { %234 = vadd.xlane.f32.xlu0 %v233_v12  ;;  %626 = vmatprep.subr.msk.mxu0 %vm229_vm0, %v221_v3 }
  0x18   : > { %250 = vadd.xlane.f32.xlu1 %v249_v14 }
  0x1a   : > { %627 = vmatpush3.xpose.msk.msra.mxu0 %vm229_vm0, %v221_v3 }
  0x1b   : > { %253 = vadd.xlane.f32.xlu0 %v252_v15 }
  0x1d   : > { %629 = vmatmul.mubr.msk.f32.vlgmr.msra.gmra.mxu0 %vm229_vm0, %v295_v16 }
  0x9c   : > { %v232_v18 = vpop.xlane.xlu0 %231 }
  0x9d   : > { %237 = vst.msk [vmem:[#allocation2] sm:$0xff] %vm236_vm1, %v232_v18  ;;  %v248_v22 = vpop.xlane.xlu1 %247 }
  0xa0   : > { %v235_v19 = vpop.xlane.xlu0 %234 }
  0xa1   : > { %238 = vst.msk [vmem:[#allocation2 + $0x8] sm:$0xff] %vm236_vm1, %v235_v19  ;;  %v251_v23 = vpop.xlane.xlu1 %250  ;;  %v443_v19 = vld [vmem:[#allocation6] sm:$0x1] }
  0xa4   : > { %v290_v20 = vld [vmem:[#allocation2] sm:$0xff]  ;;  %v254_v24 = vpop.xlane.xlu0 %253 }
  0xa5   : > { %395 = vperm.xlu1 %662, %v290_v20  }
  0xa8   : > { %v291_v21 = vld [vmem:[#allocation2 + $0x8] sm:$0xff] }
  0xa9   : > { %400 = vperm.xlu0 %663, %v291_v21  }
  0xce   : > { %255 = vxpose.xlu1.b32.start [1/3] (short) (narrow) %v248_v22, 8 }
  0xd2   : > { %256 = vxpose.xlu1.b32.cont [2/3] (short) (narrow) %v251_v23, 8 }
  0xd6   : > { %257 = vxpose.xlu1.b32.end [3/3] (short) (narrow) %v254_v24, 8 }
  0xdd   : > { %v630_v27 = vpop.f32.mrf.mxu0 }
  0xdf   : > { %v384_v29 = vpop.f32.mrf.mxu0 }
 0x120   : > { %v396_v25 = vpop.permute.xlu1 %395 }
 0x124   : > { %v401_v30 = vpop.permute.xlu0 %400 }
 0x14a   : > { %v271_v26 = vpop.trf.xlu1 }
 0x14b   : > { %289 = vst.msk [vmem:[#allocation3] sm:$0x1] %vm288_vm2, %v271_v26  ;;  %v510_v26 = vlaneseq }
 0x152   : > { %v608_v28 = vld [vmem:[#allocation3] ss:$0 sm:$0xff] }
 0x153   : > { %v390_v31 = vadd.f32 %v630_v27, %v608_v28  ;;  %v385_v32 = vadd.f32 %v608_v28, %v384_v29  ;;  %v511_v27 = vshrl.u32 %v510_v26, 7 }
 0x155   : > { %v404_v33 = vadd.f32 %v401_v30, %v390_v31  ;;  %v403_v34 = vadd.f32 %v396_v25, %v385_v32  ;;  %v512_v28 = vsub.s32 0, %v511_v27 }
 0x157   : > { %v406_v35 = vsel %vm405_vm3, %v403_v34, inf  ;;  %v409_v36 = vsel %vm405_vm3, %v404_v33, inf }
 0x158   : > { %407 = vmin.xlane.f32.xlu0 %v406_v35  ;;  %410 = vmin.xlane.f32.xlu1 %v409_v36  ;;  %v412_v37 = vmin.f32 %v406_v35, %v409_v36 }
 0x15a   : > { %v413_v38 = vrot.slane %v412_v37, 4 }
 0x15c   : > { %v414_v39 = vmin.f32 %v412_v37, %v413_v38 }
 0x15e   : > { %v415_v40 = vrot.slane %v414_v39, 2 }
 0x160   : > { %v416_v41 = vmin.f32 %v414_v39, %v415_v40 }
 0x162   : > { %v417_v42 = vrot.slane %v416_v41, 1 }
 0x164   : > { %v418_v43 = vmin.f32 %v416_v41, %v417_v42 }
 0x166   : > { %v480_v44 = vmax.f32 %v418_v43, 0.0 }
 0x168   : > { %664 = vrsqrt.f32 %v480_v44  ;;  %vm483_vm4 = vcmp.eq.f32.partialorder %v480_v44, inf  ;;  %v486_v47 = vand.u32 2147483648, %v480_v44  ;;  %vm485_vm5 = vcmp.eq.f32.partialorder %v480_v44, 0.0 }
 0x175   : > { %v665_v45 = vpop.eup %664 }
 0x176   : > { %v482_v46 = vmul.f32 %v665_v45, %v480_v44 }
 0x178   : > { %v484_v48 = vsel %vm483_vm4, %v480_v44, %v482_v46 }
 0x179   : > { %v487_v49 = vsel %vm485_vm5, %v486_v47, %v484_v48 }
 0x17a   : > { %v488_v50 = vsel %vm288_vm2, %v487_v49, 0.0 }
 0x1e1   : > { %v411_v51 = vpop.xlane.xlu1 %410  ;;  %v408_v52 = vpop.xlane.xlu0 %407 }
 0x1e2   : > { %v445_v53 = vmax.f32 %v411_v51, 0.0  ;;  %v444_v54 = vmax.f32 %v408_v52, 0.0 }
 0x1e4   : > { %666 = vrsqrt.f32 %v445_v53  ;;  %vm455_vm6 = vcmp.eq.f32.partialorder %v445_v53, inf  ;;  %v458_v59 = vand.u32 2147483648, %v445_v53  ;;  %vm448_vm7 = vcmp.eq.f32.partialorder %v444_v54, inf }
 0x1e5   : > { %668 = vrsqrt.f32 %v444_v54  ;;  %v451_v60 = vand.u32 2147483648, %v444_v54  ;;  %vm457_vm8 = vcmp.eq.f32.partialorder %v445_v53, 0.0  ;;  %vm450_vm9 = vcmp.eq.f32.partialorder %v444_v54, 0.0 }
 0x1f1   : > { %v667_v55 = vpop.eup %666 }
 0x1f2   : > { %v669_v56 = vpop.eup %668  ;;  %v454_v57 = vmul.f32 %v667_v55, %v445_v53 }
 0x1f3   : > { %v447_v58 = vmul.f32 %v669_v56, %v444_v54 }
 0x1f4   : > { %v456_v61 = vsel %vm455_vm6, %v445_v53, %v454_v57 }
 0x1f5   : > { %v449_v62 = vsel %vm448_vm7, %v444_v54, %v447_v58  ;;  %v459_v63 = vsel %vm457_vm8, %v458_v59, %v456_v61 }
 0x1f6   : > { %v452_v0 = vsel %vm450_vm9, %v451_v60, %v449_v62  ;;  %v461_v1 = vsel %vm236_vm1, %v459_v63, 0.0 }
 0x1f7   : > { %v460_v2 = vsel %vm236_vm1, %v452_v0, 0.0 }
 0x1f8   : > { %v462_v3 = vadd.f32 %v461_v1, %v460_v2 }
 0x1fa   : > { %463 = vadd.xlane.f32.xlu0 %v462_v3 }
 0x1fe   : > { %489 = vadd.xlane.f32.xlu0 %v488_v50 }
 0x283   : > { %v464_v5 = vpop.xlane.xlu0 %463 }
 0x284   : > { %v465_v6 = vrot.slane %v464_v5, 4 }
 0x286   : > { %v466_v7 = vadd.f32 %v465_v6, %v464_v5 }
 0x287   : > { %v490_v8 = vpop.xlane.xlu0 %489 }
 0x288   : > { %v467_v9 = vrot.slane %v466_v7, 2  ;;  %v491_v10 = vrot.slane %v490_v8, 4 }
 0x28a   : > { %v492_v11 = vadd.f32 %v491_v10, %v490_v8  ;;  %v468_v12 = vadd.f32 %v467_v9, %v466_v7 }
 0x28c   : > { %v493_v13 = vrot.slane %v492_v11, 2  ;;  %v469_v14 = vrot.slane %v468_v12, 1 }
 0x28e   : > { %v470_v15 = vadd.f32 %v469_v14, %v468_v12  ;;  %v494_v16 = vadd.f32 %v493_v13, %v492_v11 }
 0x290   : > { %632 = vpush %v470_v15  ;;  %v495_v17 = vrot.slane %v494_v16, 1 }
 0x292   : > { %v496_v18 = vadd.f32 %v495_v17, %v494_v16 }
 0x294   : > { %634 = vpush %v496_v18 }
 0x2c1   : > { %s633_s21 = spop %632 }
 0x2c2   : > { %v472_v20 = vstv %s633_s21 }
 0x2c3   : > { %v473_v21 = vadd.f32 %v472_v20, %v443_v19 }
 0x2c5   : > { %475 = vst.msk [vmem:[#allocation6] sm:$0x1] %vm217_vm10, %v473_v21  ;;  %s635_s22 = spop %634 }
 0x2c6   : > { %v498_v23 = vstv %s635_s22 }
 0x2cc   : > { %v479_v22 = vld [vmem:[#allocation6] sm:$0x1] }
 0x2cd   : > { %v499_v24 = vadd.f32 %v498_v23, %v479_v22 }
 0x2cf   : > { %501 = vst.msk [vmem:[#allocation6] sm:$0x1] %vm217_vm10, %v499_v24 }
 0x2d6   : > { %v504_v25 = vld [vmem:[#allocation6] sm:$0x1] }
 0x2d7   : > { %507 = vperm.xlu0 %663, %v504_v25  }
 0x352   : > { %v508_v29 = vpop.permute.xlu0 %507 }
 0x353   : > { %v513_v30 = vrot.slane %v508_v29, %v512_v28 }
 0x355   : > { %514 = vst [vmem:[%s210_s25] sm:$0x1] %v513_v30 }
 0x356 PF: > { %s12_s11 = sadd.s32 1, %s692_s11   ;;  %s777_s9 = smov %s688_s10 }
 0x357   : > { %p9_p5 = scmp.ge.s32.totalorder %s12_s11, 4   ;;  %s778_s10 = smov %s780_s12 }
 0x359   :  { %11 = sbr.rel (!%p9_p5) target bundleno = 2 (0x2), region = 88 }

</bundles_post_ra>
